<compile_context>
chip_gen: v7x
topology: tpu7x:2x2x1
jax: 0.10.0
libtpu: 0.0.40
codegen_flags: <defaults>
</compile_context>

<pallas_src>
import functools

import jax
import jax.numpy as jnp
from jax import lax
from jax.experimental import pallas as pl
from jax.experimental.pallas import tpu as pltpu


def _mlp_relu_kernel(x_ref, w1_ref, b1_ref, w2_ref, b2_ref, w3_ref, b3_ref,
                     o_ref):
    """Fused (Linear + ReLU) x3 on one batch tile, all f32."""
    x = x_ref[...]                                                # [Bt, n_in]

    h = jnp.dot(x, w1_ref[...], preferred_element_type=jnp.float32)
    h = jnp.maximum(h + b1_ref[...], 0.0)                         # [Bt, 16]

    h = jnp.dot(h, w2_ref[...], preferred_element_type=jnp.float32)
    h = jnp.maximum(h + b2_ref[...], 0.0)                         # [Bt, 16]

    h = jnp.dot(h, w3_ref[...], preferred_element_type=jnp.float32)
    h = jnp.maximum(h + b3_ref[...], 0.0)                         # [Bt, n_out]

    o_ref[...] = h.astype(o_ref.dtype)


@functools.partial(jax.jit, static_argnames=("block_b",))
def relu_model_forward(x, params, *, block_b=8192):
    """x: [B, n_input] f32 -> [B, n_output] f32 (matches the PyTorch module).

    params: output of prepare_params() — weights [in, out], biases [1, out].
    """
    B, n_in = x.shape
    hidden = params["w1"].shape[1]
    n_out = params["w3"].shape[1]

    # Tile the batch (second-minor axis; must be a multiple of 8 or the full
    # extent).  If a single tile would cover a large batch, split into >=2 so
    # both v7x TensorCores get work under the "parallel" axis.
    if block_b >= B:
        if B >= 256:
            block_b = ((pl.cdiv(B, 2) + 7) // 8) * 8
        else:
            block_b = B
    else:
        block_b = max(8, (block_b // 8) * 8)
    grid = (pl.cdiv(B, block_b),)

    const = lambda i: (0, 0)  # weights/biases: fetched once, resident across grid
    in_specs = [
        pl.BlockSpec((block_b, n_in), lambda i: (i, 0)),
        pl.BlockSpec((n_in, hidden), const),
        pl.BlockSpec((1, hidden), const),
        pl.BlockSpec((hidden, hidden), const),
        pl.BlockSpec((1, hidden), const),
        pl.BlockSpec((hidden, n_out), const),
        pl.BlockSpec((1, n_out), const),
    ]
    out_specs = pl.BlockSpec((block_b, n_out), lambda i: (i, 0))

    return pl.pallas_call(
        _mlp_relu_kernel,
        out_shape=jax.ShapeDtypeStruct((B, n_out), x.dtype),
        grid=grid,
        in_specs=in_specs,
        out_specs=out_specs,
        compiler_params=pltpu.CompilerParams(
            # Independent batch tiles -> shard across TensorCores (v7x megacore).
            dimension_semantics=("parallel",),
            # Lane-padded [Bt,128] blocks: ~16 MB double-buffered at Bt=8192.
            # 32 MiB covers v5e's 16 MiB default and fits v7x's 64 MiB physical.
            vmem_limit_bytes=32 * 1024 * 1024,
        ),
    )(x, params["w1"], params["b1"], params["w2"], params["b2"],
      params["w3"], params["b3"])


def prepare_params(torch_params):
    """One-time layout prep (call once, outside the hot path):
    PyTorch weights [out, in] -> [in, out]; biases [out] -> [1, out] rows."""
    def prep(w, b):
        return jnp.asarray(w, jnp.float32).T, jnp.asarray(b, jnp.float32).reshape(1, -1)

    w1, b1 = prep(torch_params["w1"], torch_params["b1"])
    w2, b2 = prep(torch_params["w2"], torch_params["b2"])
    w3, b3 = prep(torch_params["w3"], torch_params["b3"])
    return {"w1": w1, "b1": b1, "w2": w2, "b2": b2, "w3": w3, "b3": b3}


def init_params(key, n_input, n_output, hidden=16, dtype=jnp.float32):
    """PyTorch-style uniform(+-1/sqrt(fan_in)) init, torch-native layout
    (weights [out, in], biases [out])."""
    ks = jax.random.split(key, 6)

    def lin(kw, kb, fan_in, fan_out):
        bound = 1.0 / float(fan_in) ** 0.5
        w = jax.random.uniform(kw, (fan_out, fan_in), dtype, -bound, bound)
        b = jax.random.uniform(kb, (fan_out,), dtype, -bound, bound)
        return w, b

    w1, b1 = lin(ks[0], ks[1], n_input, hidden)
    w2, b2 = lin(ks[2], ks[3], hidden, hidden)
    w3, b3 = lin(ks[4], ks[5], hidden, n_output)
    return {"w1": w1, "b1": b1, "w2": w2, "b2": b2, "w3": w3, "b3": b3}


def reference_forward(x, torch_params):
    """Pure-JAX f32 reference of the PyTorch module (torch-layout params)."""
    hp = lax.Precision.HIGHEST
    h = jnp.maximum(jnp.dot(x, torch_params["w1"].T, precision=hp) + torch_params["b1"], 0.0)
    h = jnp.maximum(jnp.dot(h, torch_params["w2"].T, precision=hp) + torch_params["b2"], 0.0)
    return jnp.maximum(jnp.dot(h, torch_params["w3"].T, precision=hp) + torch_params["b3"], 0.0)


if __name__ == "__main__":
    n_input, n_output = 32, 8
    batch, block_b = 256, 128   # grid = 2 "parallel" steps -> feeds both v7x TCs

    key = jax.random.PRNGKey(0)
    k_params, k_x = jax.random.split(key)
    torch_params = init_params(k_params, n_input, n_output)
    params = prepare_params(torch_params)          # one-time layout prep
    x = jax.random.normal(k_x, (batch, n_input), jnp.float32)

    out = jax.block_until_ready(relu_model_forward(x, params, block_b=block_b))
    ref = reference_forward(x, torch_params)

    assert out.shape == (batch, n_output), out.shape
    # f32 end-to-end (typical max abs error ~1e-6); tolerance covers MXU f32
    # multi-pass rounding differences only.
    err = float(jnp.max(jnp.abs(out - ref)))
    assert jnp.allclose(out, ref, atol=2e-3, rtol=2e-3), err

    print("KERNEL_OK")
</pallas_src>

<mosaic_0001>
module attributes {stable_mosaic.version = 11 : i64} {
  func.func @_mlp_relu_kernel(%arg0: i32, %arg1: memref<128x32xf32, #tpu.memory_space<vmem>>, %arg2: memref<32x16xf32, #tpu.memory_space<vmem>>, %arg3: memref<1x16xf32, #tpu.memory_space<vmem>>, %arg4: memref<16x16xf32, #tpu.memory_space<vmem>>, %arg5: memref<1x16xf32, #tpu.memory_space<vmem>>, %arg6: memref<16x8xf32, #tpu.memory_space<vmem>>, %arg7: memref<1x8xf32, #tpu.memory_space<vmem>>, %arg8: memref<128x8xf32, #tpu.memory_space<vmem>>) attributes {dimension_semantics = [#tpu.dimension_semantics<parallel>], iteration_bounds = array<i64: 2>, scalar_prefetch = 0 : i64, scratch_operands = 0 : i64, tpu.core_type = #tpu.core_type<tc>, window_params = [{transform_indices = @transform_0, window_bounds = array<i64: 128, 32>}, {pipeline_mode = #tpu.pipeline_mode<synchronous>, transform_indices = @transform_1, window_bounds = array<i64: 32, 16>}, {pipeline_mode = #tpu.pipeline_mode<synchronous>, transform_indices = @transform_2, window_bounds = array<i64: 1, 16>}, {pipeline_mode = #tpu.pipeline_mode<synchronous>, transform_indices = @transform_3, window_bounds = array<i64: 16, 16>}, {pipeline_mode = #tpu.pipeline_mode<synchronous>, transform_indices = @transform_4, window_bounds = array<i64: 1, 16>}, {pipeline_mode = #tpu.pipeline_mode<synchronous>, transform_indices = @transform_5, window_bounds = array<i64: 16, 8>}, {pipeline_mode = #tpu.pipeline_mode<synchronous>, transform_indices = @transform_6, window_bounds = array<i64: 1, 8>}, {transform_indices = @transform_7, window_bounds = array<i64: 128, 8>}]} {
    %c0 = arith.constant 0 : index
    %c0_0 = arith.constant 0 : index
    %0 = vector.load %arg1[%c0, %c0_0] : memref<128x32xf32, #tpu.memory_space<vmem>>, vector<128x32xf32>
    %c0_1 = arith.constant 0 : index
    %c0_2 = arith.constant 0 : index
    %1 = vector.load %arg2[%c0_1, %c0_2] : memref<32x16xf32, #tpu.memory_space<vmem>>, vector<32x16xf32>
    %cst = arith.constant dense<0.000000e+00> : vector<128x16xf32>
    %2 = tpu.matmul %0, %1, %cst {dimension_numbers = #tpu.dot_dimension_numbers<[1], [0], [0], [1], [0, 0, 1, 1], [], []>} : vector<128x32xf32>, vector<32x16xf32>, vector<128x16xf32> -> vector<128x16xf32>
    %c0_3 = arith.constant 0 : index
    %c0_4 = arith.constant 0 : index
    %3 = vector.load %arg3[%c0_3, %c0_4] : memref<1x16xf32, #tpu.memory_space<vmem>>, vector<1x16xf32>
    %4 = vector.broadcast %3 : vector<1x16xf32> to vector<128x16xf32>
    %5 = arith.addf %2, %4 : vector<128x16xf32>
    %cst_5 = arith.constant 0.000000e+00 : f32
    %6 = vector.broadcast %cst_5 : f32 to vector<128x16xf32>
    %7 = arith.maximumf %5, %6 : vector<128x16xf32>
    %c0_6 = arith.constant 0 : index
    %c0_7 = arith.constant 0 : index
    %8 = vector.load %arg4[%c0_6, %c0_7] : memref<16x16xf32, #tpu.memory_space<vmem>>, vector<16x16xf32>
    %cst_8 = arith.constant dense<0.000000e+00> : vector<128x16xf32>
    %9 = tpu.matmul %7, %8, %cst_8 {dimension_numbers = #tpu.dot_dimension_numbers<[1], [0], [0], [1], [0, 0, 1, 1], [], []>} : vector<128x16xf32>, vector<16x16xf32>, vector<128x16xf32> -> vector<128x16xf32>
    %c0_9 = arith.constant 0 : index
    %c0_10 = arith.constant 0 : index
    %10 = vector.load %arg5[%c0_9, %c0_10] : memref<1x16xf32, #tpu.memory_space<vmem>>, vector<1x16xf32>
    %11 = vector.broadcast %10 : vector<1x16xf32> to vector<128x16xf32>
    %12 = arith.addf %9, %11 : vector<128x16xf32>
    %cst_11 = arith.constant 0.000000e+00 : f32
    %13 = vector.broadcast %cst_11 : f32 to vector<128x16xf32>
    %14 = arith.maximumf %12, %13 : vector<128x16xf32>
    %c0_12 = arith.constant 0 : index
    %c0_13 = arith.constant 0 : index
    %15 = vector.load %arg6[%c0_12, %c0_13] : memref<16x8xf32, #tpu.memory_space<vmem>>, vector<16x8xf32>
    %cst_14 = arith.constant dense<0.000000e+00> : vector<128x8xf32>
    %16 = tpu.matmul %14, %15, %cst_14 {dimension_numbers = #tpu.dot_dimension_numbers<[1], [0], [0], [1], [0, 0, 1, 1], [], []>} : vector<128x16xf32>, vector<16x8xf32>, vector<128x8xf32> -> vector<128x8xf32>
    %c0_15 = arith.constant 0 : index
    %c0_16 = arith.constant 0 : index
    %17 = vector.load %arg7[%c0_15, %c0_16] : memref<1x8xf32, #tpu.memory_space<vmem>>, vector<1x8xf32>
    %18 = vector.broadcast %17 : vector<1x8xf32> to vector<128x8xf32>
    %19 = arith.addf %16, %18 : vector<128x8xf32>
    %cst_17 = arith.constant 0.000000e+00 : f32
    %20 = vector.broadcast %cst_17 : f32 to vector<128x8xf32>
    %21 = arith.maximumf %19, %20 : vector<128x8xf32>
    %c0_18 = arith.constant 0 : index
    %c0_19 = arith.constant 0 : index
    %22 = vector.load %arg8[%c0_18, %c0_19] : memref<128x8xf32, #tpu.memory_space<vmem>>, vector<128x8xf32>
    tpu.vector_store %arg8[%c0_18, %c0_19], %21 {strides = array<i32>} : memref<128x8xf32, #tpu.memory_space<vmem>>, vector<128x8xf32>,
    return
  }
  func.func @transform_0(%arg0: i32) -> (i32, i32) {
    %c0_i32 = arith.constant 0 : i32
    %c0_i32_0 = arith.constant 0 : i32
    return %arg0, %c0_i32 : i32, i32
  }
  func.func @transform_1(%arg0: i32) -> (i32, i32) {
    %c0_i32 = arith.constant 0 : i32
    %c0_i32_0 = arith.constant 0 : i32
    %c0_i32_1 = arith.constant 0 : i32
    return %c0_i32, %c0_i32_0 : i32, i32
  }
  func.func @transform_2(%arg0: i32) -> (i32, i32) {
    %c0_i32 = arith.constant 0 : i32
    %c0_i32_0 = arith.constant 0 : i32
    %c0_i32_1 = arith.constant 0 : i32
    return %c0_i32, %c0_i32_0 : i32, i32
  }
  func.func @transform_3(%arg0: i32) -> (i32, i32) {
    %c0_i32 = arith.constant 0 : i32
    %c0_i32_0 = arith.constant 0 : i32
    %c0_i32_1 = arith.constant 0 : i32
    return %c0_i32, %c0_i32_0 : i32, i32
  }
  func.func @transform_4(%arg0: i32) -> (i32, i32) {
    %c0_i32 = arith.constant 0 : i32
    %c0_i32_0 = arith.constant 0 : i32
    %c0_i32_1 = arith.constant 0 : i32
    return %c0_i32, %c0_i32_0 : i32, i32
  }
  func.func @transform_5(%arg0: i32) -> (i32, i32) {
    %c0_i32 = arith.constant 0 : i32
    %c0_i32_0 = arith.constant 0 : i32
    %c0_i32_1 = arith.constant 0 : i32
    return %c0_i32, %c0_i32_0 : i32, i32
  }
  func.func @transform_6(%arg0: i32) -> (i32, i32) {
    %c0_i32 = arith.constant 0 : i32
    %c0_i32_0 = arith.constant 0 : i32
    %c0_i32_1 = arith.constant 0 : i32
    return %c0_i32, %c0_i32_0 : i32, i32
  }
  func.func @transform_7(%arg0: i32) -> (i32, i32) {
    %c0_i32 = arith.constant 0 : i32
    %c0_i32_0 = arith.constant 0 : i32
    return %arg0, %c0_i32 : i32, i32
  }
}

</mosaic_0001>

<bundles_post_ra>
// kernel: relu_model_forward.1
= control target key start
LH: loop header
LB: loop body
LE: loop exit
PB: predicated region body
PF: predicated region fallthrough
CT: control target
= control target key end

     0   :  { %s1309_s24 = smov 0   ;;  %s1466_s0 = inlined_call_operand.vmem [shape: f32[256,32], index: 0, kind: input, shape index: {}]   ;;  %s1467_s1 = inlined_call_operand.vmem [shape: f32[32,16], index: 1, kind: input, shape index: {}]   ;;  %s1468_s2 = inlined_call_operand.vmem [shape: f32[1,16], index: 2, kind: input, shape index: {}]   ;;  %s1469_s3 = inlined_call_operand.vmem [shape: f32[16,16], index: 3, kind: input, shape index: {}]   ;;  %s1470_s4 = inlined_call_operand.vmem [shape: f32[1,16], index: 4, kind: input, shape index: {}]   ;;  %s1471_s5 = inlined_call_operand.vmem [shape: f32[16,8], index: 5, kind: input, shape index: {}]   ;;  %s1472_s6 = inlined_call_operand.vmem [shape: f32[1,8], index: 6, kind: input, shape index: {}]   ;;  %s1473_s7 = inlined_call_operand.vmem [shape: f32[256,8], index: 7, kind: output, shape index: {}]  }
   0x1 LB: > { %s1029_s25 = sadd.s32 4294967295, %s1267_s24   ;;  %p1033_p0 = scmp.ge.s32.totalorder %s1267_s24, 1  ;;  %s1267_s24 = sphi %s1309_s24, %s17_s24  }
   0x2   : > { %p238_p1 = scmp.lt.s32.totalorder %s1267_s24, 3 }
   0x4   : > { %p239_p2 = pnand %p1033_p0, %p238_p1 }
   0x5   : > { %v298_v0 = vld [vmem:[%s1467_s1] sm:$0xff] (!%p239_p2)  ;;  %v299_v1 = vld [vmem:[%s1467_s1 + $0x8] sm:$0xff] (!%p239_p2)  ;;  %v300_v2 = vld [vmem:[%s1467_s1 + $0x10] sm:$0xff] (!%p239_p2)  ;;  %s1034_s9 = sshll.u32 (!%p239_p2), %s1029_s25, 4  ;;  %vm309_vm0 = vcmask (!%p239_p2), 261120   ;;  %vm528_vm1 = vcmask (!%p239_p2), 130048  }
   0x6   : > { %242 = sbr.rel (%p239_p2) target bundleno = 700 (0x2bc), region = 48  ;;  %v1235_v3 = vpack.c.bf16 (!%p239_p2), %v299_v1, %v298_v0  ;;  %v301_v4 = vld [vmem:[%s1467_s1 + $0x18] sm:$0xff] (!%p239_p2)  ;;  %p271_p3 = scmp.lt.s32.totalorder (!%p239_p2), %s1034_s9, 31  ;;  %v519_v5 = vld [vmem:[%s1469_s3] sm:$0xff] (!%p239_p2)  ;;  %v520_v6 = vld [vmem:[%s1469_s3 + $0x8] sm:$0xff] (!%p239_p2)  ;;  %vm956_vm2 = vcmask (!%p239_p2), 64512  }
   0x7   : > { %v1239_v7 = vpack.c.bf16 (!%p239_p2), %v301_v4, %v300_v2  ;;  %v1243_v8 = vpack.c.bf16 (!%p239_p2), %v520_v6, %v519_v5  ;;  %v738_v25 = vld [vmem:[%s1471_s5] sm:$0xff] (!%p239_p2)  ;;  %v739_v26 = vld [vmem:[%s1471_s5 + $0x8] sm:$0xff] (!%p239_p2) }
   0x8   : > { %1236 = vmatprep.subr.bf16.mxu0 (!%p239_p2), %v1235_v3  ;;  %v1247_v27 = vpack.c.bf16 (!%p239_p2), %v739_v26, %v738_v25  ;;  %v1038_v28 = vld [vmem:[%s1468_s2] ss:$0 sm:$0xff] (!%p239_p2) }
   0x9   : > { %1238 = vmatpush3.bf16.msra.mxu0 (!%p239_p2), %v1235_v3  ;;  %1251 = vmatprep.subr.bf16.mxu1 (!%p239_p2), %v1243_v8 }
   0xa   : > { %1240 = vmatprep.subr.bf16.mxu0 (!%p239_p2), %v1239_v7  ;;  %1252 = vmatpush3.bf16.msra.mxu1 (!%p239_p2), %v1243_v8 }
   0xb   : > { %1248 = vmatprep.subr.bf16.mxu1 (!%p239_p2), %v1247_v27 }
   0xd   : > { %s1475_s9 = smov (!%p271_p3, %s1034_s9), 31  ;;  %1242 = vmatpush3.bf16.msra.mxu0 %v1239_v7 }
   0xe   : > { %s1035_s16 = sshll.u32 %s1475_s9, 3  ;;  %1244 = vmatprep.subr.bf16.mxu0 %v1243_v8 }
   0xf   : > { %s1343_s19 = scalar_lea.vmem %s1466_s0, %s1035_s16  ;;  %s1429_s11 = scalar_lea.vmem %s1473_s7, %s1035_s16 }
  0x10   : > { %v282_v9 = vld [vmem:[%s1343_s19] sm:$0xff]  ;;  %v283_v10 = vld [vmem:[%s1343_s19 + $0x8] sm:$0xff]  ;;  %v284_v11 = vld [vmem:[%s1343_s19 + $0x10] sm:$0xff] }
  0x11   : > { %1155 = vmatprep.mubr.msk.f32.mxu0 %vm309_vm0, %v282_v9  ;;  %v285_v12 = vld [vmem:[%s1343_s19 + $0x18] sm:$0xff]  ;;  %v286_v13 = vld [vmem:[%s1343_s19 + $0x20] sm:$0xff]  ;;  %v287_v14 = vld [vmem:[%s1343_s19 + $0x28] sm:$0xff] }
  0x12   : > { %1156 = vmatmul.mubr.msk.f32.vlgmr.msra.gmra.mrb[0].mxu0 %vm309_vm0, %v283_v10  ;;  %v288_v15 = vld [vmem:[%s1343_s19 + $0x30] sm:$0xff]  ;;  %v289_v16 = vld [vmem:[%s1343_s19 + $0x38] sm:$0xff]  ;;  %v290_v17 = vld [vmem:[%s1343_s19 + $0x40] sm:$0xff] }
  0x13   : > { %1158 = vmatprep.mubr.msk.f32.mxu0 %vm309_vm0, %v284_v11  ;;  %1246 = vmatpush3.bf16.msra.mxu0 %v1243_v8  ;;  %v291_v18 = vld [vmem:[%s1343_s19 + $0x48] sm:$0xff]  ;;  %v292_v19 = vld [vmem:[%s1343_s19 + $0x50] sm:$0xff]  ;;  %v293_v20 = vld [vmem:[%s1343_s19 + $0x58] sm:$0xff] }
  0x14   : > { %v294_v21 = vld [vmem:[%s1343_s19 + $0x60] sm:$0xff]  ;;  %v295_v22 = vld [vmem:[%s1343_s19 + $0x68] sm:$0xff]  ;;  %v296_v23 = vld [vmem:[%s1343_s19 + $0x70] sm:$0xff] }
  0x15   : > { %v297_v24 = vld [vmem:[%s1343_s19 + $0x78] sm:$0xff] }
  0x16   : > { %1159 = vmatmul.mubr.msk.f32.gmra.mrb[2].mxu0 %vm309_vm0, %v285_v12 }
  0x17   : > { %1161 = vmatprep.mubr.msk.f32.mxu0 %vm309_vm0, %v286_v13  ;;  %v1055_v13 = vld [vmem:[%s1470_s4] ss:$0 sm:$0xff] }
  0x1a   : > { %1162 = vmatmul.mubr.msk.f32.gmra.mrb[4].mxu0 %vm309_vm0, %v287_v14 }
  0x1b   : > { %1164 = vmatprep.mubr.msk.f32.mxu0 %vm309_vm0, %v288_v15 }
  0x1e   : > { %1165 = vmatmul.mubr.msk.f32.gmra.mrb[6].mxu0 %vm309_vm0, %v289_v16 }
  0x1f   : > { %1167 = vmatprep.mubr.msk.f32.mxu0 %vm309_vm0, %v290_v17 }
  0x22   : > { %1168 = vmatmul.mubr.msk.f32.gmra.mrb[8].mxu0 %vm309_vm0, %v291_v18 }
  0x23   : > { %1170 = vmatprep.mubr.msk.f32.mxu0 %vm309_vm0, %v292_v19 }
  0x26   : > { %1171 = vmatmul.mubr.msk.f32.gmra.mrb[10].mxu0 %vm309_vm0, %v293_v20 }
  0x27   : > { %1173 = vmatprep.mubr.msk.f32.mxu0 %vm309_vm0, %v294_v21 }
  0x2a   : > { %1174 = vmatmul.mubr.msk.f32.gmra.mrb[12].mxu0 %vm309_vm0, %v295_v22 }
  0x2b   : > { %1176 = vmatprep.mubr.msk.f32.mxu0 %vm309_vm0, %v296_v23 }
  0x2e   : > { %1177 = vmatmul.mubr.msk.f32.gmra.mrb[14].mxu0 %vm309_vm0, %v297_v24 }
  0xe5   : > { %v1157_v29 = vpop.f32.mrb[0].mxu0 }
  0xe6   : > { %v430_v30 = vadd.f32 %v1157_v29, %v1038_v28  ;;  %v424_v31 = vpop.f32.mrb[1].mxu0 }
  0xe7   : > { %v425_v32 = vadd.f32 %v1038_v28, %v424_v31 }
  0xe8   : > { %v504_v35 = vmax.f32 %v430_v30, 0.0 }
  0xe9   : > { %v503_v33 = vmax.f32 %v425_v32, 0.0  ;;  %v1160_v34 = vpop.f32.mrb[2].mxu0 }
  0xea   : > { %v440_v36 = vadd.f32 %v1160_v34, %v1038_v28  ;;  %v434_v37 = vpop.f32.mrb[3].mxu0 }
  0xeb   : > { %v435_v38 = vadd.f32 %v1038_v28, %v434_v37  ;;  %1183 = vmatprep.mubr.msk.f32.mxu0 %vm528_vm1, %v503_v33 }
  0xec   : > { %1184 = vmatmul.mubr.msk.f32.vlgmr.msra.gmra.mrb[16].mxu0 %vm528_vm1, %v504_v35  ;;  %v506_v41 = vmax.f32 %v440_v36, 0.0 }
  0xed   : > { %v505_v39 = vmax.f32 %v435_v38, 0.0  ;;  %v1163_v40 = vpop.f32.mrb[4].mxu0 }
  0xee   : > { %v450_v42 = vadd.f32 %v1163_v40, %v1038_v28  ;;  %v444_v43 = vpop.f32.mrb[5].mxu0 }
  0xef   : > { %v445_v44 = vadd.f32 %v1038_v28, %v444_v43  ;;  %1186 = vmatprep.mubr.msk.f32.mxu0 %vm528_vm1, %v505_v39 }
  0xf0   : > { %1187 = vmatmul.mubr.msk.f32.gmra.mrb[18].mxu0 %vm528_vm1, %v506_v41  ;;  %v508_v47 = vmax.f32 %v450_v42, 0.0 }
  0xf1   : > { %v507_v45 = vmax.f32 %v445_v44, 0.0  ;;  %v1166_v46 = vpop.f32.mrb[6].mxu0 }
  0xf2   : > { %v460_v48 = vadd.f32 %v1166_v46, %v1038_v28  ;;  %v454_v49 = vpop.f32.mrb[7].mxu0 }
  0xf3   : > { %v455_v50 = vadd.f32 %v1038_v28, %v454_v49  ;;  %1189 = vmatprep.mubr.msk.f32.mxu0 %vm528_vm1, %v507_v45 }
  0xf4   : > { %1190 = vmatmul.mubr.msk.f32.gmra.mrb[20].mxu0 %vm528_vm1, %v508_v47  ;;  %v510_v53 = vmax.f32 %v460_v48, 0.0 }
  0xf5   : > { %v509_v51 = vmax.f32 %v455_v50, 0.0  ;;  %v1169_v52 = vpop.f32.mrb[8].mxu0 }
  0xf6   : > { %v470_v54 = vadd.f32 %v1169_v52, %v1038_v28  ;;  %v464_v55 = vpop.f32.mrb[9].mxu0 }
  0xf7   : > { %v465_v56 = vadd.f32 %v1038_v28, %v464_v55  ;;  %1192 = vmatprep.mubr.msk.f32.mxu1 %vm528_vm1, %v509_v51 }
  0xf8   : > { %1193 = vmatmul.mubr.msk.f32.vlgmr.msra.gmra.mrb[0].mxu1 %vm528_vm1, %v510_v53  ;;  %v512_v59 = vmax.f32 %v470_v54, 0.0 }
  0xf9   : > { %v511_v57 = vmax.f32 %v465_v56, 0.0  ;;  %v1172_v58 = vpop.f32.mrb[10].mxu0  ;;  %1250 = vmatpush3.bf16.msra.mxu1 %v1247_v27 }
  0xfa   : > { %v480_v60 = vadd.f32 %v1172_v58, %v1038_v28  ;;  %v474_v61 = vpop.f32.mrb[11].mxu0 }
  0xfb   : > { %v475_v62 = vadd.f32 %v1038_v28, %v474_v61  ;;  %1195 = vmatprep.mubr.msk.f32.mxu1 %vm528_vm1, %v511_v57 }
  0xfc   : > { %1196 = vmatmul.mubr.msk.f32.gmra.mrb[2].mxu1 %vm528_vm1, %v512_v59  ;;  %v514_v1 = vmax.f32 %v480_v60, 0.0 }
  0xfd   : > { %v513_v63 = vmax.f32 %v475_v62, 0.0  ;;  %v1175_v0 = vpop.f32.mrb[12].mxu0  ;;  %v1072_v62 = vld [vmem:[%s1472_s6] ss:$0 sm:$0xff] }
  0xfe   : > { %v490_v2 = vadd.f32 %v1175_v0, %v1038_v28  ;;  %v484_v3 = vpop.f32.mrb[13].mxu0 }
  0xff   : > { %v485_v4 = vadd.f32 %v1038_v28, %v484_v3  ;;  %1198 = vmatprep.mubr.msk.f32.mxu1 %vm528_vm1, %v513_v63 }
 0x100   : > { %1199 = vmatmul.mubr.msk.f32.gmra.mrb[4].mxu1 %vm528_vm1, %v514_v1  ;;  %v516_v7 = vmax.f32 %v490_v2, 0.0 }
 0x101   : > { %v515_v5 = vmax.f32 %v485_v4, 0.0  ;;  %v1178_v6 = vpop.f32.mrb[14].mxu0 }
 0x102   : > { %v500_v8 = vadd.f32 %v1178_v6, %v1038_v28  ;;  %v494_v9 = vpop.f32.mrb[15].mxu0 }
 0x103   : > { %v495_v10 = vadd.f32 %v1038_v28, %v494_v9  ;;  %1201 = vmatprep.mubr.msk.f32.mxu1 %vm528_vm1, %v515_v5 }
 0x104   : > { %1202 = vmatmul.mubr.msk.f32.gmra.mrb[6].mxu1 %vm528_vm1, %v516_v7  ;;  %v518_v12 = vmax.f32 %v500_v8, 0.0 }
 0x105   : > { %v517_v11 = vmax.f32 %v495_v10, 0.0 }
 0x107   : > { %1204 = vmatprep.mubr.msk.f32.mxu1 %vm528_vm1, %v517_v11 }
 0x108   : > { %1205 = vmatmul.mubr.msk.f32.gmra.mrb[8].mxu1 %vm528_vm1, %v518_v12 }
 0x1bf   : > { %v1185_v14 = vpop.f32.mrb[16].mxu0 }
 0x1c0   : > { %v649_v15 = vadd.f32 %v1185_v14, %v1055_v13  ;;  %v643_v16 = vpop.f32.mrb[17].mxu0 }
 0x1c1   : > { %v644_v17 = vadd.f32 %v1055_v13, %v643_v16 }
 0x1c2   : > { %v723_v20 = vmax.f32 %v649_v15, 0.0 }
 0x1c3   : > { %v722_v18 = vmax.f32 %v644_v17, 0.0  ;;  %v1188_v19 = vpop.f32.mrb[18].mxu0 }
 0x1c4   : > { %v659_v21 = vadd.f32 %v1188_v19, %v1055_v13  ;;  %v653_v22 = vpop.f32.mrb[19].mxu0 }
 0x1c5   : > { %v654_v23 = vadd.f32 %v1055_v13, %v653_v22  ;;  %1211 = vmatprep.mubr.msk.f32.mxu1 %vm528_vm1, %v722_v18 }
 0x1c6   : > { %1212 = vmatmul.mubr.msk.f32.vlgmr.msra.gmra.mrb[10].mxu1 %vm528_vm1, %v723_v20  ;;  %v725_v26 = vmax.f32 %v659_v21, 0.0 }
 0x1c7   : > { %v724_v24 = vmax.f32 %v654_v23, 0.0  ;;  %v1191_v25 = vpop.f32.mrb[20].mxu0 }
 0x1c8   : > { %v669_v27 = vadd.f32 %v1191_v25, %v1055_v13  ;;  %v663_v28 = vpop.f32.mrb[21].mxu0 }
 0x1c9   : > { %v664_v29 = vadd.f32 %v1055_v13, %v663_v28  ;;  %1214 = vmatprep.mubr.msk.f32.mxu1 %vm528_vm1, %v724_v24 }
 0x1ca   : > { %1215 = vmatmul.mubr.msk.f32.gmra.mrb[12].mxu1 %vm528_vm1, %v725_v26  ;;  %v727_v32 = vmax.f32 %v669_v27, 0.0 }
 0x1cb   : > { %v726_v30 = vmax.f32 %v664_v29, 0.0  ;;  %v1194_v31 = vpop.f32.mrb[0].mxu1 }
 0x1cc   : > { %v679_v33 = vadd.f32 %v1194_v31, %v1055_v13  ;;  %v673_v34 = vpop.f32.mrb[1].mxu1 }
 0x1cd   : > { %v674_v35 = vadd.f32 %v1055_v13, %v673_v34  ;;  %1217 = vmatprep.mubr.msk.f32.mxu1 %vm528_vm1, %v726_v30 }
 0x1ce   : > { %1218 = vmatmul.mubr.msk.f32.gmra.mrb[14].mxu1 %vm528_vm1, %v727_v32  ;;  %v729_v38 = vmax.f32 %v679_v33, 0.0 }
 0x1cf   : > { %v728_v36 = vmax.f32 %v674_v35, 0.0  ;;  %v1197_v37 = vpop.f32.mrb[2].mxu1 }
 0x1d0   : > { %v689_v39 = vadd.f32 %v1197_v37, %v1055_v13  ;;  %v683_v40 = vpop.f32.mrb[3].mxu1 }
 0x1d1   : > { %v684_v41 = vadd.f32 %v1055_v13, %v683_v40  ;;  %1220 = vmatprep.mubr.msk.f32.mxu1 %vm528_vm1, %v728_v36 }
 0x1d2   : > { %1221 = vmatmul.mubr.msk.f32.gmra.mrb[16].mxu1 %vm528_vm1, %v729_v38  ;;  %v731_v44 = vmax.f32 %v689_v39, 0.0 }
 0x1d3   : > { %v730_v42 = vmax.f32 %v684_v41, 0.0  ;;  %v1200_v43 = vpop.f32.mrb[4].mxu1 }
 0x1d4   : > { %v699_v45 = vadd.f32 %v1200_v43, %v1055_v13  ;;  %v693_v46 = vpop.f32.mrb[5].mxu1 }
 0x1d5   : > { %v694_v47 = vadd.f32 %v1055_v13, %v693_v46  ;;  %1223 = vmatprep.mubr.msk.f32.mxu1 %vm528_vm1, %v730_v42 }
 0x1d6   : > { %1224 = vmatmul.mubr.msk.f32.gmra.mrb[18].mxu1 %vm528_vm1, %v731_v44  ;;  %v733_v50 = vmax.f32 %v699_v45, 0.0 }
 0x1d7   : > { %v732_v48 = vmax.f32 %v694_v47, 0.0  ;;  %v1203_v49 = vpop.f32.mrb[6].mxu1 }
 0x1d8   : > { %v709_v51 = vadd.f32 %v1203_v49, %v1055_v13  ;;  %v703_v52 = vpop.f32.mrb[7].mxu1 }
 0x1d9   : > { %v704_v53 = vadd.f32 %v1055_v13, %v703_v52  ;;  %1226 = vmatprep.mubr.msk.f32.mxu1 %vm528_vm1, %v732_v48 }
 0x1da   : > { %1227 = vmatmul.mubr.msk.f32.gmra.mrb[20].mxu1 %vm528_vm1, %v733_v50  ;;  %v735_v56 = vmax.f32 %v709_v51, 0.0 }
 0x1db   : > { %v734_v54 = vmax.f32 %v704_v53, 0.0  ;;  %v1206_v55 = vpop.f32.mrb[8].mxu1 }
 0x1dc   : > { %v719_v57 = vadd.f32 %v1206_v55, %v1055_v13  ;;  %v713_v58 = vpop.f32.mrb[9].mxu1 }
 0x1dd   : > { %v714_v59 = vadd.f32 %v1055_v13, %v713_v58  ;;  %1229 = vmatprep.mubr.msk.f32.mxu1 %vm528_vm1, %v734_v54 }
 0x1de   : > { %1230 = vmatmul.mubr.msk.f32.gmra.mrb[22].mxu1 %vm528_vm1, %v735_v56  ;;  %v737_v61 = vmax.f32 %v719_v57, 0.0 }
 0x1df   : > { %v736_v60 = vmax.f32 %v714_v59, 0.0 }
 0x1e1   : > { %1232 = vmatprep.mubr.msk.f32.mxu1 %vm528_vm1, %v736_v60 }
 0x1e2   : > { %1233 = vmatmul.mubr.msk.f32.gmra.mrb[24].mxu1 %vm528_vm1, %v737_v61 }
 0x299   : > { %v1213_v63 = vpop.f32.mrb[10].mxu1 }
 0x29a   : > { %v867_v0 = vadd.f32 %v1213_v63, %v1072_v62  ;;  %v861_v1 = vpop.f32.mrb[11].mxu1 }
 0x29b   : > { %v862_v2 = vadd.f32 %v1072_v62, %v861_v1 }
 0x29c   : > { %v941_v3 = vmax.f32 %v867_v0, 0.0 }
 0x29d   : > { %v940_v4 = vmax.f32 %v862_v2, 0.0  ;;  %v1216_v5 = vpop.f32.mrb[12].mxu1 }
 0x29e   : > { %958 = vst.msk [vmem:[%s1429_s11 + $0x8] sm:$0xff] %vm956_vm2, %v941_v3  ;;  %v877_v6 = vadd.f32 %v1216_v5, %v1072_v62  ;;  %v871_v7 = vpop.f32.mrb[13].mxu1 }
 0x29f   : > { %957 = vst.msk [vmem:[%s1429_s11] sm:$0xff] %vm956_vm2, %v940_v4  ;;  %v872_v8 = vadd.f32 %v1072_v62, %v871_v7 }
 0x2a0   : > { %v943_v9 = vmax.f32 %v877_v6, 0.0 }
 0x2a1   : > { %v942_v10 = vmax.f32 %v872_v8, 0.0  ;;  %v1219_v11 = vpop.f32.mrb[14].mxu1 }
 0x2a2   : > { %960 = vst.msk [vmem:[%s1429_s11 + $0x18] sm:$0xff] %vm956_vm2, %v943_v9  ;;  %v887_v12 = vadd.f32 %v1219_v11, %v1072_v62  ;;  %v881_v13 = vpop.f32.mrb[15].mxu1 }
 0x2a3   : > { %959 = vst.msk [vmem:[%s1429_s11 + $0x10] sm:$0xff] %vm956_vm2, %v942_v10  ;;  %v882_v14 = vadd.f32 %v1072_v62, %v881_v13 }
 0x2a4   : > { %v945_v15 = vmax.f32 %v887_v12, 0.0 }
 0x2a5   : > { %v944_v16 = vmax.f32 %v882_v14, 0.0  ;;  %v1222_v17 = vpop.f32.mrb[16].mxu1 }
 0x2a6   : > { %962 = vst.msk [vmem:[%s1429_s11 + $0x28] sm:$0xff] %vm956_vm2, %v945_v15  ;;  %v897_v18 = vadd.f32 %v1222_v17, %v1072_v62  ;;  %v891_v19 = vpop.f32.mrb[17].mxu1 }
 0x2a7   : > { %961 = vst.msk [vmem:[%s1429_s11 + $0x20] sm:$0xff] %vm956_vm2, %v944_v16  ;;  %v892_v20 = vadd.f32 %v1072_v62, %v891_v19 }
 0x2a8   : > { %v947_v21 = vmax.f32 %v897_v18, 0.0 }
 0x2a9   : > { %v946_v22 = vmax.f32 %v892_v20, 0.0  ;;  %v1225_v23 = vpop.f32.mrb[18].mxu1 }
 0x2aa   : > { %964 = vst.msk [vmem:[%s1429_s11 + $0x38] sm:$0xff] %vm956_vm2, %v947_v21  ;;  %v907_v24 = vadd.f32 %v1225_v23, %v1072_v62  ;;  %v901_v25 = vpop.f32.mrb[19].mxu1 }
 0x2ab   : > { %963 = vst.msk [vmem:[%s1429_s11 + $0x30] sm:$0xff] %vm956_vm2, %v946_v22  ;;  %v902_v26 = vadd.f32 %v1072_v62, %v901_v25 }
 0x2ac   : > { %v949_v27 = vmax.f32 %v907_v24, 0.0 }
 0x2ad   : > { %v948_v28 = vmax.f32 %v902_v26, 0.0  ;;  %v1228_v29 = vpop.f32.mrb[20].mxu1 }
 0x2ae   : > { %966 = vst.msk [vmem:[%s1429_s11 + $0x48] sm:$0xff] %vm956_vm2, %v949_v27  ;;  %v917_v30 = vadd.f32 %v1228_v29, %v1072_v62  ;;  %v911_v31 = vpop.f32.mrb[21].mxu1 }
 0x2af   : > { %965 = vst.msk [vmem:[%s1429_s11 + $0x40] sm:$0xff] %vm956_vm2, %v948_v28  ;;  %v912_v32 = vadd.f32 %v1072_v62, %v911_v31 }
 0x2b0   : > { %v951_v33 = vmax.f32 %v917_v30, 0.0 }
 0x2b1   : > { %v950_v34 = vmax.f32 %v912_v32, 0.0  ;;  %v1231_v35 = vpop.f32.mrb[22].mxu1 }
 0x2b2   : > { %968 = vst.msk [vmem:[%s1429_s11 + $0x58] sm:$0xff] %vm956_vm2, %v951_v33  ;;  %v927_v36 = vadd.f32 %v1231_v35, %v1072_v62  ;;  %v921_v37 = vpop.f32.mrb[23].mxu1 }
 0x2b3   : > { %967 = vst.msk [vmem:[%s1429_s11 + $0x50] sm:$0xff] %vm956_vm2, %v950_v34  ;;  %v922_v38 = vadd.f32 %v1072_v62, %v921_v37 }
 0x2b4   : > { %v953_v39 = vmax.f32 %v927_v36, 0.0 }
 0x2b5   : > { %v952_v40 = vmax.f32 %v922_v38, 0.0  ;;  %v1234_v41 = vpop.f32.mrb[24].mxu1 }
 0x2b6   : > { %970 = vst.msk [vmem:[%s1429_s11 + $0x68] sm:$0xff] %vm956_vm2, %v953_v39  ;;  %v937_v42 = vadd.f32 %v1234_v41, %v1072_v62  ;;  %v931_v43 = vpop.f32.mrb[25].mxu1 }
 0x2b7   : > { %969 = vst.msk [vmem:[%s1429_s11 + $0x60] sm:$0xff] %vm956_vm2, %v952_v40  ;;  %v932_v44 = vadd.f32 %v1072_v62, %v931_v43 }
 0x2b8   : > { %v955_v45 = vmax.f32 %v937_v42, 0.0 }
 0x2b9   : > { %v954_v46 = vmax.f32 %v932_v44, 0.0 }
 0x2ba   : > { %972 = vst.msk [vmem:[%s1429_s11 + $0x78] sm:$0xff] %vm956_vm2, %v955_v45 }
 0x2bb   : > { %971 = vst.msk [vmem:[%s1429_s11 + $0x70] sm:$0xff] %vm956_vm2, %v954_v46 }
 0x2bc PF: > { %s17_s24 = sadd.s32 1, %s1267_s24  }
 0x2bd   : > { %p14_p4 = scmp.ge.s32.totalorder %s17_s24, 4  }
 0x2bf   :  { %16 = sbr.rel (!%p14_p4) target bundleno = 1 (0x1), region = 78 }

</bundles_post_ra>
